<compile_context>
chip_gen: v5e
topology: v5e:2x2
jax: 0.10.0
libtpu: 0.0.40
codegen_flags: <defaults>
</compile_context>

<pallas_src>
import jax
import jax.numpy as jnp
from jax.experimental import pallas as pl
from jax.experimental.pallas import tpu as pltpu

LANE = 128
SUBLANE = 8


def _round_up(x, m):
    return (x + m - 1) // m * m


# ---------------------------------------------------------------------------
# Fused decode kernel: grid=(T,) over decode steps.
# Each step: Bahdanau attention + GRU cell + output projection.
# ---------------------------------------------------------------------------
def fused_decode_kernel(
    x_emb_ref,   # (1, Bp, emb)      time-blocked
    enc_ref,     # (Bp, S, E)        resident
    e_proj_ref,  # (Bp, S, Ap)       resident: enc @ w_ae + b_a (precomputed once)
    h0_ref,      # (Bp, Dp)          resident: initial hidden
    w_ah_ref,    # (Dp, Ap)
    v_ref,       # (1, Ap)
    wi_ref,      # (emb+E, 3*Dp)     gate blocks r|z|n, 128 lanes each
    wh_ref,      # (Dp, 3*Dp)
    b_i_ref,     # (1, 3*Dp)
    b_h_ref,     # (1, 3*Dp)
    wo_ref,      # (emb+E+Dp, Op)    rows ordered [emb ; ctx ; h]
    b_o_ref,     # (1, Op)
    pred_ref,    # (1, Bp, Op)       time-blocked output
    h_out_ref,   # (Bp, Dp)          resident output (written at last step)
    h_sc,        # (Bp, Dp) VMEM     hidden-state carry across grid steps
):
    f32 = jnp.float32
    t = pl.program_id(0)

    @pl.when(t == 0)
    def _init():
        h_sc[...] = h0_ref[...]

    x_emb = x_emb_ref[0]            # (Bp, emb)
    h = h_sc[...]                   # (Bp, Dp); padded lanes stay 0 (see invariant)
    enc = enc_ref[...]              # (Bp, S, E)
    emb = x_emb.shape[-1]
    E = enc.shape[-1]
    Dp = h.shape[-1]

    # ---- Bahdanau attention (batched, lane-dense energies) -----------------
    h_proj = jnp.dot(h, w_ah_ref[...], preferred_element_type=f32)      # (Bp, Ap)
    energy = jnp.tanh(e_proj_ref[...] + h_proj[:, None, :])             # (Bp, S, Ap)
    score = jnp.sum(energy * v_ref[...], axis=-1)                       # (Bp, S) lane reduce
    m = jnp.max(score, axis=-1, keepdims=True)
    p = jnp.exp(score - m)
    attn = p * pl.reciprocal(jnp.sum(p, axis=-1, keepdims=True), approx=True)
    # TODO(synk): for production S >> 8 switch the context reduction to a dot_general so
    # the S-reduction runs on the MXU, and S-tile enc/e_proj (v7x has only 64 MiB VMEM).
    context = jnp.sum(attn[:, :, None] * enc, axis=1)                   # (Bp, E) == bmm

    # ---- GRU cell: packed weights, split dots via static row slices --------
    gi = (jnp.dot(x_emb, wi_ref[0:emb, :], preferred_element_type=f32)
          + jnp.dot(context, wi_ref[emb:emb + E, :], preferred_element_type=f32)
          + b_i_ref[...])                                               # (Bp, 3*Dp)
    gh = jnp.dot(h, wh_ref[...], preferred_element_type=f32) + b_h_ref[...]
    r = jax.nn.sigmoid(gi[:, 0:Dp] + gh[:, 0:Dp])
    z = jax.nn.sigmoid(gi[:, Dp:2 * Dp] + gh[:, Dp:2 * Dp])
    n = jnp.tanh(gi[:, 2 * Dp:3 * Dp] + r * gh[:, 2 * Dp:3 * Dp])
    h_new = (1.0 - z) * n + z * h                                       # padded lanes stay 0

    # ---- output projection over [x_emb ; context ; h_new] ------------------
    pred = (jnp.dot(x_emb, wo_ref[0:emb, :], preferred_element_type=f32)
            + jnp.dot(context, wo_ref[emb:emb + E, :], preferred_element_type=f32)
            + jnp.dot(h_new, wo_ref[emb + E:emb + E + Dp, :], preferred_element_type=f32)
            + b_o_ref[...])                                             # (Bp, Op)

    pred_ref[0] = pred.astype(pred_ref.dtype)
    h_sc[...] = h_new

    @pl.when(t == pl.num_programs(0) - 1)
    def _finalize():
        h_out_ref[...] = h_new.astype(h_out_ref.dtype)


# ---------------------------------------------------------------------------
# Host-side parameter packing (done once, outside the decode loop)
# ---------------------------------------------------------------------------
def pack_params(params):
    emb_dim = params["embedding"].shape[1]
    enc_hid = params["w_ae"].shape[0]
    dec_hid = params["w_ah"].shape[0]
    out_dim = params["w_out"].shape[1]

    Dp = _round_up(dec_hid, LANE)   # padded hidden / gate-block width
    Ap = _round_up(dec_hid, LANE)   # padded attention-energy width
    Op = _round_up(out_dim, LANE)   # padded output width
    f32 = jnp.float32

    def pad(a, shape):
        z = jnp.zeros(shape, f32)
        return z.at[tuple(slice(0, s) for s in a.shape)].set(a.astype(f32))

    def pack3(mats, rows_pad):
        # each gate (r, z, n) in its own 128-lane block -> vreg-aligned slices in-kernel
        out = jnp.zeros((rows_pad, 3 * Dp), f32)
        for g, w in enumerate(mats):
            out = out.at[: w.shape[0], g * Dp: g * Dp + w.shape[1]].set(w.astype(f32))
        return out

    w_out = params["w_out"]
    wo = jnp.zeros((emb_dim + enc_hid + Dp, Op), f32)
    wo = wo.at[: emb_dim + enc_hid, :out_dim].set(w_out[: emb_dim + enc_hid].astype(f32))
    wo = wo.at[emb_dim + enc_hid: emb_dim + enc_hid + dec_hid, :out_dim].set(
        w_out[emb_dim + enc_hid:].astype(f32))

    # TODO(synk): on v6e/v7x store weights/enc as bf16 (cast to f32 in-kernel) to halve the
    # one-time HBM->VMEM bytes; kept f32 here so results match the f32 reference exactly.
    return {
        "embedding": params["embedding"].astype(f32),
        # attention
        "w_ah": pad(params["w_ah"], (Dp, Ap)),
        "w_ae": pad(params["w_ae"], (enc_hid, Ap)),
        "b_a": pad(params["b_a"], (1, Ap)),
        "v": pad(params["v"].T, (1, Ap)),
        # GRU (gate order r, z, n); input weights already row-ordered [emb ; context]
        "wi": pack3([params["w_ir"], params["w_iz"], params["w_in"]], emb_dim + enc_hid),
        "wh": pack3([params["w_hr"], params["w_hz"], params["w_hn"]], Dp),
        "b_i": pack3([params["b_ir"], params["b_iz"], params["b_in"]], 1),
        "b_h": pack3([params["b_hr"], params["b_hz"], params["b_hn"]], 1),
        # output projection, rows ordered [emb ; ctx ; h (padded to Dp)]
        "wo": wo,
        "b_o": pad(params["b_out"], (1, Op)),
    }


# ---------------------------------------------------------------------------
# Wrappers
# ---------------------------------------------------------------------------
def gru_attention_decode(packed, tokens, hidden, encoder_outputs):
    """Fused autoregressive decode with teacher-forced tokens.

    tokens: (T, B) int32; hidden: (1, B, dec_hid); encoder_outputs: (S, B, enc_hid).
    Returns (predictions (T, B, out_dim), final hidden (1, B, dec_hid)).
    """
    T, B = tokens.shape
    S, _, E = encoder_outputs.shape
    D = hidden.shape[-1]
    out_dim, emb_dim = packed["embedding"].shape
    Bp = _round_up(B, SUBLANE)
    Dp = packed["wh"].shape[0]
    Op = packed["wo"].shape[1]

    # One-time glue (amortized over all T steps): embedding gather for the whole token
    # sequence, batch padding, and the encoder projection as a plain XLA einsum.
    x_emb = jnp.take(packed["embedding"], tokens, axis=0)                 # (T, B, emb)
    x_emb_p = jnp.zeros((T, Bp, emb_dim), jnp.float32).at[:, :B].set(x_emb)
    enc_p = jnp.zeros((Bp, S, E), jnp.float32).at[:B].set(
        jnp.transpose(encoder_outputs, (1, 0, 2)).astype(jnp.float32))
    e_proj_p = jnp.einsum("bse,ea->bsa", enc_p, packed["w_ae"]) + packed["b_a"]
    h0_p = jnp.zeros((Bp, Dp), jnp.float32).at[:B, :D].set(hidden[0])

    def resident(arr):
        nd = arr.ndim
        return pl.BlockSpec(arr.shape, lambda t: (0,) * nd)   # constant -> DMA'd once

    args = (x_emb_p, enc_p, e_proj_p, h0_p,
            packed["w_ah"], packed["v"],
            packed["wi"], packed["wh"], packed["b_i"], packed["b_h"],
            packed["wo"], packed["b_o"])
    in_specs = [pl.BlockSpec((1, Bp, emb_dim), lambda t: (t, 0, 0))] + [
        resident(a) for a in args[1:]]

    preds_p, h_last_p = pl.pallas_call(
        fused_decode_kernel,
        out_shape=(jax.ShapeDtypeStruct((T, Bp, Op), jnp.float32),
                   jax.ShapeDtypeStruct((Bp, Dp), jnp.float32)),
        grid_spec=pltpu.PrefetchScalarGridSpec(
            num_scalar_prefetch=0,
            grid=(T,),
            in_specs=in_specs,
            out_specs=(pl.BlockSpec((1, Bp, Op), lambda t: (t, 0, 0)),
                       pl.BlockSpec((Bp, Dp), lambda t: (0, 0))),
            scratch_shapes=[pltpu.VMEM((Bp, Dp), jnp.float32)],
        ),
        compiler_params=pltpu.CompilerParams(
            dimension_semantics=("arbitrary",)),   # hidden state carried across steps
    )(*args)

    return preds_p[:, :B, :out_dim], h_last_p[:B, :D][None, :, :]


def decoder_with_attention_forward(packed, input_tokens, hidden, encoder_outputs):
    """Single decode step, matching DecoderWithAttention.forward in eval mode."""
    preds, h_new = gru_attention_decode(
        packed, input_tokens[None, :], hidden, encoder_outputs)
    return preds[0], h_new


# ---------------------------------------------------------------------------
# Pure-JAX reference (raw, unpacked params) for verification
# ---------------------------------------------------------------------------
def decoder_with_attention_ref(params, input_tokens, hidden, encoder_outputs):
    x_emb = jnp.take(params["embedding"], input_tokens, axis=0)
    h = hidden[0]
    enc = jnp.transpose(encoder_outputs, (1, 0, 2))
    h_proj = h @ params["w_ah"]
    e_proj = jnp.einsum("bse,ea->bsa", enc, params["w_ae"])
    energy = jnp.tanh(e_proj + h_proj[:, None, :] + params["b_a"])
    score = jnp.einsum("bsa,ao->bso", energy, params["v"])[..., 0]
    attn_w = jax.nn.softmax(score, axis=-1)
    context = jnp.einsum("bs,bse->be", attn_w, enc)
    x_cat = jnp.concatenate([x_emb, context], axis=-1)
    r = jax.nn.sigmoid(x_cat @ params["w_ir"] + params["b_ir"] + h @ params["w_hr"] + params["b_hr"])
    z = jax.nn.sigmoid(x_cat @ params["w_iz"] + params["b_iz"] + h @ params["w_hz"] + params["b_hz"])
    n = jnp.tanh(x_cat @ params["w_in"] + params["b_in"] + r * (h @ params["w_hn"] + params["b_hn"]))
    h_new = (1.0 - z) * n + z * h
    cat2 = jnp.concatenate([x_cat, h_new], axis=-1)
    pred = cat2 @ params["w_out"] + params["b_out"]
    return pred, h_new[None, :, :]


def decode_ref(params, tokens, hidden, encoder_outputs):
    preds, h = [], hidden
    for t in range(tokens.shape[0]):
        p, h = decoder_with_attention_ref(params, tokens[t], h, encoder_outputs)
        preds.append(p)
    return jnp.stack(preds), h


if __name__ == "__main__":
    key = jax.random.PRNGKey(0)
    B, S, T = 2, 8, 4
    output_dim, emb_dim, enc_hid, dec_hid = 64, 32, 32, 32

    ks = iter(jax.random.split(key, 32))
    u = lambda shape: jax.random.uniform(next(ks), shape, jnp.float32, -0.1, 0.1)

    # TODO(synk): dropout layers are identity here (eval-mode forward); GRU inter-layer
    # dropout is a no-op for a single-layer GRU anyway.
    params = {
        "embedding": u((output_dim, emb_dim)),
        # attention: Linear(enc_hid + dec_hid -> dec_hid) split into hidden/enc halves, v: dec_hid -> 1
        "w_ah": u((dec_hid, dec_hid)),
        "w_ae": u((enc_hid, dec_hid)),
        "b_a": u((1, dec_hid)),
        "v": u((dec_hid, 1)),
        # GRU (gate order r, z, n), stored (in_features, out_features)
        "w_ir": u((emb_dim + enc_hid, dec_hid)),
        "w_iz": u((emb_dim + enc_hid, dec_hid)),
        "w_in": u((emb_dim + enc_hid, dec_hid)),
        "b_ir": u((1, dec_hid)),
        "b_iz": u((1, dec_hid)),
        "b_in": u((1, dec_hid)),
        "w_hr": u((dec_hid, dec_hid)),
        "w_hz": u((dec_hid, dec_hid)),
        "w_hn": u((dec_hid, dec_hid)),
        "b_hr": u((1, dec_hid)),
        "b_hz": u((1, dec_hid)),
        "b_hn": u((1, dec_hid)),
        # out: Linear(emb_dim + enc_hid + dec_hid -> output_dim), columns ordered [emb ; ctx ; h]
        "w_out": u((emb_dim + enc_hid + dec_hid, output_dim)),
        "b_out": u((1, output_dim)),
    }

    input_tokens = jax.random.randint(next(ks), (B,), 0, output_dim, dtype=jnp.int32)
    tokens_seq = jax.random.randint(next(ks), (T, B), 0, output_dim, dtype=jnp.int32)
    hidden = u((1, B, dec_hid))
    encoder_outputs = u((S, B, enc_hid))

    packed = pack_params(params)   # one-time host-side packing / padding

    # 1) module forward (single decode step), matching the PyTorch spec
    pred, h_new = jax.jit(decoder_with_attention_forward)(
        packed, input_tokens, hidden, encoder_outputs)
    jax.block_until_ready((pred, h_new))
    pred_ref, h_ref = decoder_with_attention_ref(params, input_tokens, hidden, encoder_outputs)
    assert pred.shape == (B, output_dim) and h_new.shape == (1, B, dec_hid)
    assert jnp.allclose(pred, pred_ref, atol=1e-3, rtol=1e-3)
    assert jnp.allclose(h_new, h_ref, atol=1e-3, rtol=1e-3)

    # 2) fused multi-step decode: one pallas_call covers all T steps
    preds_seq, h_T = jax.jit(gru_attention_decode)(
        packed, tokens_seq, hidden, encoder_outputs)
    jax.block_until_ready((preds_seq, h_T))
    preds_seq_ref, h_T_ref = decode_ref(params, tokens_seq, hidden, encoder_outputs)
    assert preds_seq.shape == (T, B, output_dim) and h_T.shape == (1, B, dec_hid)
    assert jnp.allclose(preds_seq, preds_seq_ref, atol=1e-3, rtol=1e-3)
    assert jnp.allclose(h_T, h_T_ref, atol=1e-3, rtol=1e-3)

    print("KERNEL_OK")
</pallas_src>

<mosaic_0001>
module attributes {stable_mosaic.version = 11 : i64} {
  func.func @fused_decode_kernel(%arg0: i32, %arg1: memref<1x8x32xf32, #tpu.memory_space<vmem>>, %arg2: memref<8x8x32xf32, #tpu.memory_space<vmem>>, %arg3: memref<8x8x128xf32, #tpu.memory_space<vmem>>, %arg4: memref<8x128xf32, #tpu.memory_space<vmem>>, %arg5: memref<128x128xf32, #tpu.memory_space<vmem>>, %arg6: memref<1x128xf32, #tpu.memory_space<vmem>>, %arg7: memref<64x384xf32, #tpu.memory_space<vmem>>, %arg8: memref<128x384xf32, #tpu.memory_space<vmem>>, %arg9: memref<1x384xf32, #tpu.memory_space<vmem>>, %arg10: memref<1x384xf32, #tpu.memory_space<vmem>>, %arg11: memref<192x128xf32, #tpu.memory_space<vmem>>, %arg12: memref<1x128xf32, #tpu.memory_space<vmem>>, %arg13: memref<1x8x128xf32, #tpu.memory_space<vmem>>, %arg14: memref<8x128xf32, #tpu.memory_space<vmem>>, %arg15: memref<8x128xf32, #tpu.memory_space<vmem>>) attributes {dimension_semantics = [#tpu.dimension_semantics<arbitrary>], iteration_bounds = array<i64: 1>, scalar_prefetch = 0 : i64, scratch_operands = 1 : i64, tpu.core_type = #tpu.core_type<tc>, window_params = [{transform_indices = @transform_0, window_bounds = array<i64: 1, 8, 32>}, {pipeline_mode = #tpu.pipeline_mode<synchronous>, transform_indices = @transform_1, window_bounds = array<i64: 8, 8, 32>}, {pipeline_mode = #tpu.pipeline_mode<synchronous>, transform_indices = @transform_2, window_bounds = array<i64: 8, 8, 128>}, {pipeline_mode = #tpu.pipeline_mode<synchronous>, transform_indices = @transform_3, window_bounds = array<i64: 8, 128>}, {pipeline_mode = #tpu.pipeline_mode<synchronous>, transform_indices = @transform_4, window_bounds = array<i64: 128, 128>}, {pipeline_mode = #tpu.pipeline_mode<synchronous>, transform_indices = @transform_5, window_bounds = array<i64: 1, 128>}, {pipeline_mode = #tpu.pipeline_mode<synchronous>, transform_indices = @transform_6, window_bounds = array<i64: 64, 384>}, {pipeline_mode = #tpu.pipeline_mode<synchronous>, transform_indices = @transform_7, window_bounds = array<i64: 128, 384>}, {pipeline_mode = #tpu.pipeline_mode<synchronous>, transform_indices = @transform_8, window_bounds = array<i64: 1, 384>}, {pipeline_mode = #tpu.pipeline_mode<synchronous>, transform_indices = @transform_9, window_bounds = array<i64: 1, 384>}, {pipeline_mode = #tpu.pipeline_mode<synchronous>, transform_indices = @transform_10, window_bounds = array<i64: 192, 128>}, {pipeline_mode = #tpu.pipeline_mode<synchronous>, transform_indices = @transform_11, window_bounds = array<i64: 1, 128>}, {transform_indices = @transform_12, window_bounds = array<i64: 1, 8, 128>}, {pipeline_mode = #tpu.pipeline_mode<synchronous>, transform_indices = @transform_13, window_bounds = array<i64: 8, 128>}]} {
    %c0_i32 = arith.constant 0 : i32
    %0 = arith.cmpi eq, %arg0, %c0_i32 : i32
    %1 = arith.extui %0 : i1 to i32
    %c0_i32_0 = arith.constant 0 : i32
    %2 = arith.cmpi ne, %1, %c0_i32_0 : i32
    scf.if %2 {
      %c0_51 = arith.constant 0 : index
      %c0_52 = arith.constant 0 : index
      %90 = vector.load %arg4[%c0_51, %c0_52] : memref<8x128xf32, #tpu.memory_space<vmem>>, vector<8x128xf32>
      %c0_53 = arith.constant 0 : index
      %c0_54 = arith.constant 0 : index
      %91 = vector.load %arg15[%c0_53, %c0_54] : memref<8x128xf32, #tpu.memory_space<vmem>>, vector<8x128xf32>
      tpu.vector_store %arg15[%c0_53, %c0_54], %90 {strides = array<i32>} : memref<8x128xf32, #tpu.memory_space<vmem>>, vector<8x128xf32>,
    } else {
    }
    %c0 = arith.constant 0 : index
    %c0_1 = arith.constant 0 : index
    %c0_2 = arith.constant 0 : index
    %3 = vector.load %arg1[%c0, %c0_1, %c0_2] : memref<1x8x32xf32, #tpu.memory_space<vmem>>, vector<1x8x32xf32>
    %4 = vector.shape_cast %3 : vector<1x8x32xf32> to vector<8x32xf32>
    %c0_3 = arith.constant 0 : index
    %c0_4 = arith.constant 0 : index
    %5 = vector.load %arg15[%c0_3, %c0_4] : memref<8x128xf32, #tpu.memory_space<vmem>>, vector<8x128xf32>
    %c0_5 = arith.constant 0 : index
    %c0_6 = arith.constant 0 : index
    %c0_7 = arith.constant 0 : index
    %6 = vector.load %arg2[%c0_5, %c0_6, %c0_7] : memref<8x8x32xf32, #tpu.memory_space<vmem>>, vector<8x8x32xf32>
    %c0_8 = arith.constant 0 : index
    %c0_9 = arith.constant 0 : index
    %7 = vector.load %arg5[%c0_8, %c0_9] : memref<128x128xf32, #tpu.memory_space<vmem>>, vector<128x128xf32>
    %cst = arith.constant dense<0.000000e+00> : vector<8x128xf32>
    %8 = tpu.matmul %5, %7, %cst {dimension_numbers = #tpu.dot_dimension_numbers<[1], [0], [0], [1], [0, 0, 1, 1], [], []>} : vector<8x128xf32>, vector<128x128xf32>, vector<8x128xf32> -> vector<8x128xf32>
    %c0_10 = arith.constant 0 : index
    %c0_11 = arith.constant 0 : index
    %c0_12 = arith.constant 0 : index
    %9 = vector.load %arg3[%c0_10, %c0_11, %c0_12] : memref<8x8x128xf32, #tpu.memory_space<vmem>>, vector<8x8x128xf32>
    %10 = vector.shape_cast %8 : vector<8x128xf32> to vector<8x1x128xf32>
    %11 = vector.broadcast %10 : vector<8x1x128xf32> to vector<8x8x128xf32>
    %12 = arith.addf %9, %11 : vector<8x8x128xf32>
    %13 = math.tanh %12 : vector<8x8x128xf32>
    %c0_13 = arith.constant 0 : index
    %c0_14 = arith.constant 0 : index
    %14 = vector.load %arg6[%c0_13, %c0_14] : memref<1x128xf32, #tpu.memory_space<vmem>>, vector<1x128xf32>
    %15 = vector.shape_cast %14 : vector<1x128xf32> to vector<1x1x128xf32>
    %16 = vector.broadcast %15 : vector<1x1x128xf32> to vector<8x8x128xf32>
    %17 = arith.mulf %13, %16 : vector<8x8x128xf32>
    %cst_15 = arith.constant dense<0.000000e+00> : vector<8x8xf32>
    %18 = vector.multi_reduction <add>, %17, %cst_15 [2] : vector<8x8x128xf32> to vector<8x8xf32>
    %cst_16 = arith.constant dense<0xFF800000> : vector<8xf32>
    %19 = vector.multi_reduction <maximumf>, %18, %cst_16 [1] : vector<8x8xf32> to vector<8xf32>
    %20 = vector.shape_cast %19 : vector<8xf32> to vector<8x1xf32>
    %21 = vector.broadcast %20 : vector<8x1xf32> to vector<8x8xf32>
    %22 = arith.subf %18, %21 : vector<8x8xf32>
    %23 = math.exp %22 : vector<8x8xf32>
    %cst_17 = arith.constant dense<0.000000e+00> : vector<8xf32>
    %24 = vector.multi_reduction <add>, %23, %cst_17 [1] : vector<8x8xf32> to vector<8xf32>
    %25 = vector.shape_cast %24 : vector<8xf32> to vector<8x1xf32>
    %26 = tpu.reciprocal %25 {approx = true} : vector<8x1xf32> -> vector<8x1xf32>
    %27 = vector.broadcast %26 : vector<8x1xf32> to vector<8x8xf32>
    %28 = arith.mulf %23, %27 : vector<8x8xf32>
    %29 = vector.shape_cast %28 : vector<8x8xf32> to vector<8x8x1xf32>
    %30 = vector.broadcast %29 : vector<8x8x1xf32> to vector<8x8x32xf32>
    %31 = arith.mulf %30, %6 : vector<8x8x32xf32>
    %cst_18 = arith.constant dense<0.000000e+00> : vector<8x32xf32>
    %32 = vector.multi_reduction <add>, %31, %cst_18 [1] : vector<8x8x32xf32> to vector<8x32xf32>
    %c0_19 = arith.constant 0 : index
    %c0_20 = arith.constant 0 : index
    %33 = vector.load %arg7[%c0_19, %c0_20] : memref<64x384xf32, #tpu.memory_space<vmem>>, vector<32x384xf32>
    %cst_21 = arith.constant dense<0.000000e+00> : vector<8x384xf32>
    %34 = tpu.matmul %4, %33, %cst_21 {dimension_numbers = #tpu.dot_dimension_numbers<[1], [0], [0], [1], [0, 0, 1, 1], [], []>} : vector<8x32xf32>, vector<32x384xf32>, vector<8x384xf32> -> vector<8x384xf32>
    %c32 = arith.constant 32 : index
    %c0_22 = arith.constant 0 : index
    %35 = vector.load %arg7[%c32, %c0_22] : memref<64x384xf32, #tpu.memory_space<vmem>>, vector<32x384xf32>
    %cst_23 = arith.constant dense<0.000000e+00> : vector<8x384xf32>
    %36 = tpu.matmul %32, %35, %cst_23 {dimension_numbers = #tpu.dot_dimension_numbers<[1], [0], [0], [1], [0, 0, 1, 1], [], []>} : vector<8x32xf32>, vector<32x384xf32>, vector<8x384xf32> -> vector<8x384xf32>
    %37 = arith.addf %34, %36 : vector<8x384xf32>
    %c0_24 = arith.constant 0 : index
    %c0_25 = arith.constant 0 : index
    %38 = vector.load %arg9[%c0_24, %c0_25] : memref<1x384xf32, #tpu.memory_space<vmem>>, vector<1x384xf32>
    %39 = vector.broadcast %38 : vector<1x384xf32> to vector<8x384xf32>
    %40 = arith.addf %37, %39 : vector<8x384xf32>
    %c0_26 = arith.constant 0 : index
    %c0_27 = arith.constant 0 : index
    %41 = vector.load %arg8[%c0_26, %c0_27] : memref<128x384xf32, #tpu.memory_space<vmem>>, vector<128x384xf32>
    %cst_28 = arith.constant dense<0.000000e+00> : vector<8x384xf32>
    %42 = tpu.matmul %5, %41, %cst_28 {dimension_numbers = #tpu.dot_dimension_numbers<[1], [0], [0], [1], [0, 0, 1, 1], [], []>} : vector<8x128xf32>, vector<128x384xf32>, vector<8x384xf32> -> vector<8x384xf32>
    %c0_29 = arith.constant 0 : index
    %c0_30 = arith.constant 0 : index
    %43 = vector.load %arg10[%c0_29, %c0_30] : memref<1x384xf32, #tpu.memory_space<vmem>>, vector<1x384xf32>
    %44 = vector.broadcast %43 : vector<1x384xf32> to vector<8x384xf32>
    %45 = arith.addf %42, %44 : vector<8x384xf32>
    %46 = vector.extract_strided_slice %40 {offsets = [0, 0], sizes = [8, 128], strides = [1, 1]} : vector<8x384xf32> to vector<8x128xf32>
    %47 = vector.extract_strided_slice %45 {offsets = [0, 0], sizes = [8, 128], strides = [1, 1]} : vector<8x384xf32> to vector<8x128xf32>
    %48 = arith.addf %46, %47 : vector<8x128xf32>
    %49 = arith.negf %48 : vector<8x128xf32>
    %50 = math.exp %49 : vector<8x128xf32>
    %cst_31 = arith.constant 1.000000e+00 : f32
    %51 = vector.broadcast %cst_31 : f32 to vector<8x128xf32>
    %52 = arith.addf %51, %50 : vector<8x128xf32>
    %53 = arith.divf %51, %52 : vector<8x128xf32>
    %54 = vector.extract_strided_slice %40 {offsets = [0, 128], sizes = [8, 128], strides = [1, 1]} : vector<8x384xf32> to vector<8x128xf32>
    %55 = vector.extract_strided_slice %45 {offsets = [0, 128], sizes = [8, 128], strides = [1, 1]} : vector<8x384xf32> to vector<8x128xf32>
    %56 = arith.addf %54, %55 : vector<8x128xf32>
    %57 = arith.negf %56 : vector<8x128xf32>
    %58 = math.exp %57 : vector<8x128xf32>
    %cst_32 = arith.constant 1.000000e+00 : f32
    %59 = vector.broadcast %cst_32 : f32 to vector<8x128xf32>
    %60 = arith.addf %59, %58 : vector<8x128xf32>
    %61 = arith.divf %59, %60 : vector<8x128xf32>
    %62 = vector.extract_strided_slice %40 {offsets = [0, 256], sizes = [8, 128], strides = [1, 1]} : vector<8x384xf32> to vector<8x128xf32>
    %63 = vector.extract_strided_slice %45 {offsets = [0, 256], sizes = [8, 128], strides = [1, 1]} : vector<8x384xf32> to vector<8x128xf32>
    %64 = arith.mulf %53, %63 : vector<8x128xf32>
    %65 = arith.addf %62, %64 : vector<8x128xf32>
    %66 = math.tanh %65 : vector<8x128xf32>
    %cst_33 = arith.constant 1.000000e+00 : f32
    %67 = vector.broadcast %cst_33 : f32 to vector<8x128xf32>
    %68 = arith.subf %67, %61 : vector<8x128xf32>
    %69 = arith.mulf %68, %66 : vector<8x128xf32>
    %70 = arith.mulf %61, %5 : vector<8x128xf32>
    %71 = arith.addf %69, %70 : vector<8x128xf32>
    %c0_34 = arith.constant 0 : index
    %c0_35 = arith.constant 0 : index
    %72 = vector.load %arg11[%c0_34, %c0_35] : memref<192x128xf32, #tpu.memory_space<vmem>>, vector<32x128xf32>
    %cst_36 = arith.constant dense<0.000000e+00> : vector<8x128xf32>
    %73 = tpu.matmul %4, %72, %cst_36 {dimension_numbers = #tpu.dot_dimension_numbers<[1], [0], [0], [1], [0, 0, 1, 1], [], []>} : vector<8x32xf32>, vector<32x128xf32>, vector<8x128xf32> -> vector<8x128xf32>
    %c32_37 = arith.constant 32 : index
    %c0_38 = arith.constant 0 : index
    %74 = vector.load %arg11[%c32_37, %c0_38] : memref<192x128xf32, #tpu.memory_space<vmem>>, vector<32x128xf32>
    %cst_39 = arith.constant dense<0.000000e+00> : vector<8x128xf32>
    %75 = tpu.matmul %32, %74, %cst_39 {dimension_numbers = #tpu.dot_dimension_numbers<[1], [0], [0], [1], [0, 0, 1, 1], [], []>} : vector<8x32xf32>, vector<32x128xf32>, vector<8x128xf32> -> vector<8x128xf32>
    %76 = arith.addf %73, %75 : vector<8x128xf32>
    %c64 = arith.constant 64 : index
    %c0_40 = arith.constant 0 : index
    %77 = vector.load %arg11[%c64, %c0_40] : memref<192x128xf32, #tpu.memory_space<vmem>>, vector<128x128xf32>
    %cst_41 = arith.constant dense<0.000000e+00> : vector<8x128xf32>
    %78 = tpu.matmul %71, %77, %cst_41 {dimension_numbers = #tpu.dot_dimension_numbers<[1], [0], [0], [1], [0, 0, 1, 1], [], []>} : vector<8x128xf32>, vector<128x128xf32>, vector<8x128xf32> -> vector<8x128xf32>
    %79 = arith.addf %76, %78 : vector<8x128xf32>
    %c0_42 = arith.constant 0 : index
    %c0_43 = arith.constant 0 : index
    %80 = vector.load %arg12[%c0_42, %c0_43] : memref<1x128xf32, #tpu.memory_space<vmem>>, vector<1x128xf32>
    %81 = vector.broadcast %80 : vector<1x128xf32> to vector<8x128xf32>
    %82 = arith.addf %79, %81 : vector<8x128xf32>
    %c0_44 = arith.constant 0 : index
    %c0_45 = arith.constant 0 : index
    %c0_46 = arith.constant 0 : index
    %83 = vector.load %arg13[%c0_44, %c0_45, %c0_46] : memref<1x8x128xf32, #tpu.memory_space<vmem>>, vector<1x8x128xf32>
    %84 = vector.shape_cast %83 : vector<1x8x128xf32> to vector<8x128xf32>
    %85 = vector.shape_cast %82 : vector<8x128xf32> to vector<1x8x128xf32>
    tpu.vector_store %arg13[%c0_44, %c0_45, %c0_46], %85 {strides = array<i32>} : memref<1x8x128xf32, #tpu.memory_space<vmem>>, vector<1x8x128xf32>,
    %c0_47 = arith.constant 0 : index
    %c0_48 = arith.constant 0 : index
    %86 = vector.load %arg15[%c0_47, %c0_48] : memref<8x128xf32, #tpu.memory_space<vmem>>, vector<8x128xf32>
    tpu.vector_store %arg15[%c0_47, %c0_48], %71 {strides = array<i32>} : memref<8x128xf32, #tpu.memory_space<vmem>>, vector<8x128xf32>,
    %c0_i32_49 = arith.constant 0 : i32
    %87 = arith.cmpi eq, %arg0, %c0_i32_49 : i32
    %88 = arith.extui %87 : i1 to i32
    %c0_i32_50 = arith.constant 0 : i32
    %89 = arith.cmpi ne, %88, %c0_i32_50 : i32
    scf.if %89 {
      %c0_51 = arith.constant 0 : index
      %c0_52 = arith.constant 0 : index
      %90 = vector.load %arg14[%c0_51, %c0_52] : memref<8x128xf32, #tpu.memory_space<vmem>>, vector<8x128xf32>
      tpu.vector_store %arg14[%c0_51, %c0_52], %71 {strides = array<i32>} : memref<8x128xf32, #tpu.memory_space<vmem>>, vector<8x128xf32>,
    } else {
    }
    return
  }
  func.func @transform_0(%arg0: i32) -> (i32, i32, i32) {
    %c0_i32 = arith.constant 0 : i32
    %c0_i32_0 = arith.constant 0 : i32
    %c0_i32_1 = arith.constant 0 : i32
    return %arg0, %c0_i32, %c0_i32_0 : i32, i32, i32
  }
  func.func @transform_1(%arg0: i32) -> (i32, i32, i32) {
    %c0_i32 = arith.constant 0 : i32
    %c0_i32_0 = arith.constant 0 : i32
    %c0_i32_1 = arith.constant 0 : i32
    %c0_i32_2 = arith.constant 0 : i32
    return %c0_i32, %c0_i32_0, %c0_i32_1 : i32, i32, i32
  }
  func.func @transform_2(%arg0: i32) -> (i32, i32, i32) {
    %c0_i32 = arith.constant 0 : i32
    %c0_i32_0 = arith.constant 0 : i32
    %c0_i32_1 = arith.constant 0 : i32
    %c0_i32_2 = arith.constant 0 : i32
    return %c0_i32, %c0_i32_0, %c0_i32_1 : i32, i32, i32
  }
  func.func @transform_3(%arg0: i32) -> (i32, i32) {
    %c0_i32 = arith.constant 0 : i32
    %c0_i32_0 = arith.constant 0 : i32
    %c0_i32_1 = arith.constant 0 : i32
    return %c0_i32, %c0_i32_0 : i32, i32
  }
  func.func @transform_4(%arg0: i32) -> (i32, i32) {
    %c0_i32 = arith.constant 0 : i32
    %c0_i32_0 = arith.constant 0 : i32
    %c0_i32_1 = arith.constant 0 : i32
    return %c0_i32, %c0_i32_0 : i32, i32
  }
  func.func @transform_5(%arg0: i32) -> (i32, i32) {
    %c0_i32 = arith.constant 0 : i32
    %c0_i32_0 = arith.constant 0 : i32
    %c0_i32_1 = arith.constant 0 : i32
    return %c0_i32, %c0_i32_0 : i32, i32
  }
  func.func @transform_6(%arg0: i32) -> (i32, i32) {
    %c0_i32 = arith.constant 0 : i32
    %c0_i32_0 = arith.constant 0 : i32
    %c0_i32_1 = arith.constant 0 : i32
    return %c0_i32, %c0_i32_0 : i32, i32
  }
  func.func @transform_7(%arg0: i32) -> (i32, i32) {
    %c0_i32 = arith.constant 0 : i32
    %c0_i32_0 = arith.constant 0 : i32
    %c0_i32_1 = arith.constant 0 : i32
    return %c0_i32, %c0_i32_0 : i32, i32
  }
  func.func @transform_8(%arg0: i32) -> (i32, i32) {
    %c0_i32 = arith.constant 0 : i32
    %c0_i32_0 = arith.constant 0 : i32
    %c0_i32_1 = arith.constant 0 : i32
    return %c0_i32, %c0_i32_0 : i32, i32
  }
  func.func @transform_9(%arg0: i32) -> (i32, i32) {
    %c0_i32 = arith.constant 0 : i32
    %c0_i32_0 = arith.constant 0 : i32
    %c0_i32_1 = arith.constant 0 : i32
    return %c0_i32, %c0_i32_0 : i32, i32
  }
  func.func @transform_10(%arg0: i32) -> (i32, i32) {
    %c0_i32 = arith.constant 0 : i32
    %c0_i32_0 = arith.constant 0 : i32
    %c0_i32_1 = arith.constant 0 : i32
    return %c0_i32, %c0_i32_0 : i32, i32
  }
  func.func @transform_11(%arg0: i32) -> (i32, i32) {
    %c0_i32 = arith.constant 0 : i32
    %c0_i32_0 = arith.constant 0 : i32
    %c0_i32_1 = arith.constant 0 : i32
    return %c0_i32, %c0_i32_0 : i32, i32
  }
  func.func @transform_12(%arg0: i32) -> (i32, i32, i32) {
    %c0_i32 = arith.constant 0 : i32
    %c0_i32_0 = arith.constant 0 : i32
    %c0_i32_1 = arith.constant 0 : i32
    return %arg0, %c0_i32, %c0_i32_0 : i32, i32, i32
  }
  func.func @transform_13(%arg0: i32) -> (i32, i32) {
    %c0_i32 = arith.constant 0 : i32
    %c0_i32_0 = arith.constant 0 : i32
    %c0_i32_1 = arith.constant 0 : i32
    return %c0_i32, %c0_i32_0 : i32, i32
  }
}

</mosaic_0001>

<bundles_post_ra>
// kernel: decoder_with_attention_forward.1
= control target key start
LH: loop header
LB: loop body
LE: loop exit
PB: predicated region body
PF: predicated region fallthrough
CT: control target
= control target key end

     0   :  { %19 = vsyncpa [#allocation4], 0  ;;  %s1365_s0 = inlined_call_operand.vmem [shape: f32[1,8,32], index: 0, kind: input, shape index: {}]   ;;  %s1366_s1 = inlined_call_operand.vmem [shape: f32[8,8,32], index: 1, kind: input, shape index: {}]   ;;  %s1367_s2 = inlined_call_operand.vmem [shape: f32[8,8,128], index: 2, kind: input, shape index: {}]   ;;  %s1368_s3 = inlined_call_operand.vmem [shape: f32[8,128], index: 3, kind: input, shape index: {}]   ;;  %s1369_s4 = inlined_call_operand.vmem [shape: f32[128,128], index: 4, kind: input, shape index: {}]   ;;  %s1370_s5 = inlined_call_operand.vmem [shape: f32[1,128], index: 5, kind: input, shape index: {}]   ;;  %s1371_s6 = inlined_call_operand.hbm [shape: f32[64,384], index: 6, kind: input, shape index: {}]   ;;  %s1372_s7 = inlined_call_operand.hbm [shape: f32[128,384], index: 7, kind: input, shape index: {}]   ;;  %s1373_s8 = inlined_call_operand.vmem [shape: f32[1,384], index: 8, kind: input, shape index: {}]   ;;  %s1374_s9 = inlined_call_operand.vmem [shape: f32[1,384], index: 9, kind: input, shape index: {}]   ;;  %s1375_s10 = inlined_call_operand.hbm [shape: f32[192,128], index: 10, kind: input, shape index: {}]   ;;  %s1376_s11 = inlined_call_operand.vmem [shape: f32[1,128], index: 11, kind: input, shape index: {}]   ;;  %s1377_s12 = inlined_call_operand.vmem [shape: f32[1,8,128], index: 12, kind: output, shape index: {0}]   ;;  %s1378_s13 = inlined_call_operand.vmem [shape: f32[8,128], index: 13, kind: output, shape index: {1}]  }
   0x1   :  { %20 = vsyncpa [#allocation6], 0  ;;  %s50_s27 = sshll.u32 %s1372_s7, 4  ;;  %s1066_s28 = smov [#allocation5]   ;;  %s51_s27 = int_to_ptr.hbm [resolvable:$true] %s50_s27 }
   0x2   :  { %s52_s29 = sshll.u32 %s1066_s28, 4  ;;  %s37_s15 = sshll.u32 %s1371_s6, 4  ;;  %s53_s29 = int_to_ptr.vmem [resolvable:$true] %s52_s29  ;;  %s38_s15 = int_to_ptr.hbm [resolvable:$true] %s37_s15 }
   0x3   :  { %s1067_s16 = smov 384   ;;  %s1068_s17 = smov 24  }
   0x4   :  { %58 = dma.hbm_to_vmem [thread:$0]  %s51_s27, 6144, %s53_s29, [#allocation6], %s1067_s16, %s1067_s16, %s1068_s17  }
   0x5   :  { %s1069_s18 = smov [#allocation3]   ;;  %s67_s22 = sshll.u32 %s1375_s10, 4  ;;  %s68_s22 = int_to_ptr.hbm [resolvable:$true] %s67_s22 }
   0x6   :  { %s39_s19 = sshll.u32 %s1069_s18, 4  ;;  %s1070_s7 = smov [#allocation7]   ;;  %s40_s19 = int_to_ptr.vmem [resolvable:$true] %s39_s19 }
   0x7   :  { %45 = dma.hbm_to_vmem [thread:$0]  %s38_s15, 3072, %s40_s19, [#allocation4], %s1067_s16, %s1067_s16, %s1068_s17  }
   0x8   :  { %s69_s23 = sshll.u32 %s1070_s7, 4  ;;  %s1071_s24 = smov 128   ;;  %s70_s23 = int_to_ptr.vmem [resolvable:$true] %s69_s23 }
   0x9   :  { %s1072_s25 = smov 8  }
   0xa   :  { %75 = dma.hbm_to_vmem [thread:$0]  %s68_s22, 3072, %s70_s23, [#allocation6], %s1071_s24, %s1071_s24, %s1072_s25  }
   0xb   :  { %1062 = dma.done.wait [#allocation4], 3072  }
   0xc   :  { %1063 = vsyncadd [#allocation4], 4294964224 }
   0xd   :  { %1064 = dma.done.wait [#allocation6], 9216  }
   0xe   :  { %1065 = vsyncadd [#allocation6], 4294958080  ;;  %v121_v0 = vld [vmem:[%s1369_s4 + $0x78] sm:$0xff]  ;;  %v120_v1 = vld [vmem:[%s1369_s4 + $0x70] sm:$0xff]  ;;  %vm236_vm0 = vcmask 1041409   ;;  %vm238_vm1 = vcmask 1042434  }
   0xf   :  { %122 = vmatpush.msra.mxu0 %v121_v0  ;;  %v119_v2 = vld [vmem:[%s1369_s4 + $0x68] sm:$0xff]  ;;  %v118_v3 = vld [vmem:[%s1369_s4 + $0x60] sm:$0xff]  ;;  %v117_v4 = vld [vmem:[%s1369_s4 + $0x58] sm:$0xff]  ;;  %vm240_vm2 = vcmask 1043459   ;;  %vm242_vm3 = vcmask 1044484   ;;  %vm244_vm4 = vcmask 1045509  }
  0x10   :  { %v116_v5 = vld [vmem:[%s1369_s4 + $0x50] sm:$0xff]  ;;  %v115_v6 = vld [vmem:[%s1369_s4 + $0x48] sm:$0xff]  ;;  %v114_v7 = vld [vmem:[%s1369_s4 + $0x40] sm:$0xff]  ;;  %vm246_vm5 = vcmask 1046534   ;;  %vm248_vm6 = vcmask 1047559   ;;  %vm251_vm7 = vcmask 64512  }
  0x11   :  { %123 = vmatpush.msra.mxu0 %v120_v1  ;;  %v113_v8 = vld [vmem:[%s1369_s4 + $0x38] sm:$0xff]  ;;  %v112_v9 = vld [vmem:[%s1369_s4 + $0x30] sm:$0xff]  ;;  %v111_v10 = vld [vmem:[%s1369_s4 + $0x28] sm:$0xff]  ;;  %vm421_vm8 = vcmask 261120  }
  0x12   :  { %v110_v11 = vld [vmem:[%s1369_s4 + $0x20] sm:$0xff]  ;;  %v109_v12 = vld [vmem:[%s1369_s4 + $0x18] sm:$0xff]  ;;  %v108_v13 = vld [vmem:[%s1369_s4 + $0x10] sm:$0xff] }
  0x13   :  { %124 = vmatpush.msra.mxu0 %v119_v2  ;;  %v107_v14 = vld [vmem:[%s1369_s4 + $0x8] sm:$0xff]  ;;  %v106_v15 = vld [vmem:[%s1369_s4] sm:$0xff]  ;;  %v144_v24 = vld [vmem:[%s1367_s2 + $0x10] sm:$0xff] }
  0x14   :  { %v1204_v16 = vld [vmem:[%s1368_s3] sm:$0xff]  ;;  %v143_v31 = vld [vmem:[%s1367_s2 + $0x8] sm:$0xff]  ;;  %v145_v38 = vld [vmem:[%s1367_s2 + $0x18] sm:$0xff] }
  0x15   :  { %125 = vmatpush.msra.mxu0 %v118_v3  ;;  %v142_v18 = vld [vmem:[%s1367_s2] sm:$0xff]  ;;  %v147_v35 = vld [vmem:[%s1367_s2 + $0x28] sm:$0xff]  ;;  %v148_v47 = vld [vmem:[%s1367_s2 + $0x30] sm:$0xff]  ;;  %v226_v3 = vlaneseq }
  0x16   :  { %v146_v23 = vld [vmem:[%s1367_s2 + $0x20] sm:$0xff]  ;;  %v149_v54 = vld [vmem:[%s1367_s2 + $0x38] sm:$0xff] }
  0x17   :  { %126 = vmatpush.msra.mxu0 %v117_v4  ;;  %v943_v40 = vld [vmem:[%s1370_s5] ss:$0 sm:$0xff] }
  0x19   :  { %127 = vmatpush.msra.mxu0 %v116_v5 }
  0x1b   :  { %128 = vmatpush.msra.mxu0 %v115_v6  ;;  %v1234_v6 = vand.u32 127, %v226_v3 }
  0x1d   :  { %129 = vmatpush.msra.mxu0 %v114_v7 }
  0x1f   :  { %130 = vmatpush.msra.mxu0 %v113_v8 }
  0x21   :  { %131 = vmatpush.msra.mxu0 %v112_v9 }
  0x23   :  { %132 = vmatpush.msra.mxu0 %v111_v10 }
  0x25   :  { %133 = vmatpush.msra.mxu0 %v110_v11 }
  0x27   :  { %134 = vmatpush.msra.mxu0 %v109_v12 }
  0x29   :  { %135 = vmatpush.msra.mxu0 %v108_v13 }
  0x2b   :  { %136 = vmatpush.msra.mxu0 %v107_v14 }
  0x2d   :  { %137 = vmatpush.msra.mxu0 %v106_v15 }
  0x2e   :  { %138 = vmatmul.f32.vlgmr.msra.gmra.mxu0 %v1204_v16 }
  0xab   :  { %v139_v17 = vpop.f32.mrf.mxu0 }
  0xac   :  { %v158_v19 = vperm.slane %v139_v17, 0  ;;  %v154_v20 = vrot.slane %v139_v17, 4  ;;  %v152_v21 = vrot.slane %v139_v17, 2  ;;  %v151_v22 = vrot.slane %v139_v17, 1 }
  0xad   :  { %v155_v25 = vrot.slane %v139_v17, 5  ;;  %v153_v26 = vrot.slane %v139_v17, 3  ;;  %v156_v39 = vrot.slane %v139_v17, 6  ;;  %v157_v43 = vrot.slane %v139_v17, 7 }
  0xae   :  { %v174_v27 = vadd.f32 %v158_v19, %v142_v18  ;;  %v162_v28 = vperm.slane %v154_v20, 0  ;;  %v160_v29 = vperm.slane %v152_v21, 0  ;;  %v159_v30 = vperm.slane %v151_v22, 0 }
  0xaf   :  { %v163_v34 = vperm.slane %v155_v25, 0  ;;  %v161_v36 = vperm.slane %v153_v26, 0  ;;  %v164_v45 = vperm.slane %v156_v39, 0  ;;  %v165_v51 = vperm.slane %v157_v43, 0 }
  0xb0   :  { %945 = vtanh.f32 %v174_v27  ;;  %v178_v32 = vadd.f32 %v162_v28, %v146_v23  ;;  %v176_v33 = vadd.f32 %v160_v29, %v144_v24  ;;  %v175_v37 = vadd.f32 %v159_v30, %v143_v31 }
  0xb1   :  { %v179_v41 = vadd.f32 %v163_v34, %v147_v35  ;;  %v177_v42 = vadd.f32 %v161_v36, %v145_v38  ;;  %v180_v53 = vadd.f32 %v164_v45, %v148_v47  ;;  %v181_v56 = vadd.f32 %v165_v51, %v149_v54 }
  0xb2   :  { %947 = vtanh.f32 %v178_v32  ;;  %v1073_v29 = vmov 0  }
  0xb3   :  { %949 = vtanh.f32 %v176_v33  ;;  %942 = vset.pattern.permute.xlu2 %v1073_v29  ;;  %941 = vset.pattern.permute.xlu1 %v1073_v29 }
  0xb4   :  { %951 = vtanh.f32 %v175_v37  ;;  %940 = vset.pattern.permute.xlu0 %v1073_v29 }
  0xb5   :  { %953 = vtanh.f32 %v179_v41 }
  0xb6   :  { %v946_v44 = vpop.eup %945  ;;  %955 = vtanh.f32 %v177_v42 }
  0xb7   :  { %v194_v46 = vmul.f32 %v946_v44, %v943_v40  ;;  %957 = vtanh.f32 %v180_v53 }
  0xb8   :  { %v948_v48 = vpop.eup %947  ;;  %959 = vtanh.f32 %v181_v56 }
  0xb9   :  { %v950_v49 = vpop.eup %949  ;;  %202 = vadd.xlane.f32.xlu0 %v194_v46  ;;  %v198_v50 = vmul.f32 %v948_v48, %v943_v40 }
  0xba   :  { %v196_v52 = vmul.f32 %v950_v49, %v943_v40  ;;  %v952_v55 = vpop.eup %951 }
  0xbb   :  { %210 = vadd.xlane.f32.xlu2 %v198_v50  ;;  %v954_v57 = vpop.eup %953  ;;  %v195_v59 = vmul.f32 %v952_v55, %v943_v40 }
  0xbc   :  { %206 = vadd.xlane.f32.xlu1 %v196_v52  ;;  %v956_v58 = vpop.eup %955  ;;  %v199_v60 = vmul.f32 %v954_v57, %v943_v40 }
  0xbd   :  { %v197_v61 = vmul.f32 %v956_v58, %v943_v40  ;;  %v958_v62 = vpop.eup %957 }
  0xbe   :  { %v960_v63 = vpop.eup %959  ;;  %v200_v0 = vmul.f32 %v958_v62, %v943_v40 }
  0xbf   :  { %v201_v1 = vmul.f32 %v960_v63, %v943_v40 }
  0xc1   :  { %204 = vadd.xlane.f32.xlu0 %v195_v59 }
  0xc3   :  { %212 = vadd.xlane.f32.xlu2 %v199_v60 }
  0xc4   :  { %208 = vadd.xlane.f32.xlu1 %v197_v61 }
  0xc9   :  { %214 = vadd.xlane.f32.xlu0 %v200_v0 }
  0xcc   :  { %216 = vadd.xlane.f32.xlu1 %v201_v1 }
 0x12c   :  { %v203_v2 = vpop.xlane.xlu0 %202 }
 0x12d   :  { %v228_v8 = vperm.slane %v203_v2, %v1234_v6 }
 0x12e   :  { %v211_v4 = vpop.xlane.xlu2 %210 }
 0x12f   :  { %v207_v5 = vpop.xlane.xlu1 %206  ;;  %v232_v15 = vperm.slane %v211_v4, %v1234_v6 }
 0x130   :  { %v230_v10 = vperm.slane %v207_v5, %v1234_v6 }
 0x134   :  { %v205_v7 = vpop.xlane.xlu0 %204 }
 0x135   :  { %v229_v9 = vperm.slane %v205_v7, %v1234_v6 }
 0x136   :  { %v213_v17 = vpop.xlane.xlu2 %212 }
 0x137   :  { %v237_v11 = vsel %vm236_vm0, %v229_v9, %v228_v8  ;;  %v209_v12 = vpop.xlane.xlu1 %208  ;;  %v233_v20 = vperm.slane %v213_v17, %v1234_v6 }
 0x138   :  { %v231_v13 = vperm.slane %v209_v12, %v1234_v6  ;;  %v239_v14 = vsel %vm238_vm1, %v230_v10, %v237_v11 }
 0x13a   :  { %v241_v18 = vsel %vm240_vm2, %v231_v13, %v239_v14 }
 0x13b   :  { %v243_v19 = vsel %vm242_vm3, %v232_v15, %v241_v18 }
 0x13c   :  { %v215_v21 = vpop.xlane.xlu0 %214  ;;  %v245_v23 = vsel %vm244_vm4, %v233_v20, %v243_v19 }
 0x13d   :  { %v234_v22 = vperm.slane %v215_v21, %v1234_v6 }
 0x13f   :  { %v217_v24 = vpop.xlane.xlu1 %216  ;;  %v247_v25 = vsel %vm246_vm5, %v234_v22, %v245_v23 }
 0x140   :  { %v235_v26 = vperm.slane %v217_v24, %v1234_v6 }
 0x142   :  { %v249_v27 = vsel %vm248_vm6, %v235_v26, %v247_v25 }
 0x143   :  { %v252_v28 = vsel %vm251_vm7, %v249_v27, -inf }
 0x144   :  { %253 = vmax.xlane.f32.xlu2 %v252_v28 }
 0x1b7   :  { %v254_v30 = vpop.xlane.xlu2 %253 }
 0x1b8   :  { %v258_v31 = vperm.slane %v254_v30, 2  ;;  %v257_v32 = vperm.slane %v254_v30, 1  ;;  %v256_v33 = vperm.slane %v254_v30, 0  ;;  %v259_v37 = vperm.slane %v254_v30, 3 }
 0x1b9   :  { %v260_v38 = vperm.slane %v254_v30, 4  ;;  %v263_v39 = vperm.slane %v254_v30, 7  ;;  %v261_v47 = vperm.slane %v254_v30, 5  ;;  %v262_v49 = vperm.slane %v254_v30, 6 }
 0x1ba   :  { %v274_v34 = vsub.f32 %v207_v5, %v258_v31  ;;  %v273_v35 = vsub.f32 %v205_v7, %v257_v32  ;;  %v272_v36 = vsub.f32 %v203_v2, %v256_v33  ;;  %v275_v43 = vsub.f32 %v209_v12, %v259_v37 }
 0x1bb   :  { %v276_v44 = vsub.f32 %v211_v4, %v260_v38  ;;  %v279_v45 = vsub.f32 %v217_v24, %v263_v39  ;;  %v277_v54 = vsub.f32 %v213_v17, %v261_v47  ;;  %v278_v55 = vsub.f32 %v215_v21, %v262_v49  ;;  %v500_v49 = vld [vmem:[#allocation3 + $0xb0] sm:$0xff] }
 0x1bc   :  { %v284_v40 = vmul.f32 1.442695, %v274_v34  ;;  %v282_v41 = vmul.f32 1.442695, %v273_v35  ;;  %v280_v42 = vmul.f32 1.442695, %v272_v36  ;;  %551 = vmatpush.msra.mxu2 %v500_v49 }
 0x1bd   :  { %v286_v46 = vmul.f32 1.442695, %v275_v43  ;;  %v288_v48 = vmul.f32 1.442695, %v276_v44  ;;  %v294_v51 = vmul.f32 1.442695, %v279_v45 }
 0x1be   :  { %961 = vpow2.f32 %v284_v40  ;;  %v290_v56 = vmul.f32 1.442695, %v277_v54  ;;  %v292_v57 = vmul.f32 1.442695, %v278_v55  ;;  %v98_v43 = vld [vmem:[%s1366_s1] sm:$0xff]  ;;  %v101_v54 = vld [vmem:[%s1366_s1 + $0x18] sm:$0xff] }
 0x1bf   :  { %963 = vpow2.f32 %v282_v41  ;;  %v100_v55 = vld [vmem:[%s1366_s1 + $0x10] sm:$0xff] }
 0x1c0   :  { %965 = vpow2.f32 %v280_v42  ;;  %v99_v42 = vld [vmem:[%s1366_s1 + $0x8] sm:$0xff]  ;;  %v104_v49 = vld [vmem:[%s1366_s1 + $0x30] sm:$0xff] }
 0x1c1   :  { %967 = vpow2.f32 %v286_v46 }
 0x1c2   :  { %969 = vpow2.f32 %v288_v48  ;;  %v499_v48 = vld [vmem:[#allocation3 + $0xa8] sm:$0xff] }
 0x1c3   :  { %971 = vpow2.f32 %v294_v51  ;;  %531 = vmatpush.msra.mxu1 %v499_v48  ;;  %v105_v48 = vld [vmem:[%s1366_s1 + $0x38] sm:$0xff] }
 0x1c4   :  { %v1252_v50 = vpop.eup %961  ;;  %973 = vpow2.f32 %v290_v56  ;;  %v493_v56 = vld [vmem:[#allocation3 + $0x78] sm:$0xff] }
 0x1c5   :  { %v964_v52 = vpop.eup %963  ;;  %311 = vperm.xlu2 %942, %v1252_v50   ;;  %975 = vpow2.f32 %v292_v57  ;;  %v494_v57 = vld [vmem:[#allocation3 + $0x80] sm:$0xff] }
 0x1c6   :  { %v966_v53 = vpop.eup %965  ;;  %308 = vperm.xlu1 %941, %v964_v52  }
 0x1c7   :  { %305 = vperm.xlu0 %940, %v966_v53   ;;  %v968_v58 = vpop.eup %967 }
 0x1c8   :  { %v970_v59 = vpop.eup %969 }
 0x1c9   :  { %v972_v60 = vpop.eup %971 }
 0x1ca   :  { %v974_v61 = vpop.eup %973 }
 0x1cb   :  { %v976_v62 = vpop.eup %975 }
 0x1cd   :  { %314 = vperm.xlu2 %942, %v968_v58  }
 0x1ce   :  { %317 = vperm.xlu1 %941, %v970_v59  }
 0x1cf   :  { %326 = vperm.xlu0 %940, %v972_v60  }
 0x1d5   :  { %320 = vperm.xlu2 %942, %v974_v61  }
 0x1d6   :  { %323 = vperm.xlu1 %941, %v976_v62  }
 0x21f   :  { %v312_v63 = vpop.permute.xlu2 %311 }
 0x220   :  { %v330_v8 = vperm.slane %v312_v63, %v1234_v6  ;;  %v487_v63 = vld [vmem:[#allocation3 + $0x48] sm:$0xff] }
 0x227   :  { %v315_v2 = vpop.permute.xlu2 %314 }
 0x228   :  { %v331_v11 = vperm.slane %v315_v2, %v1234_v6 }
 0x22f   :  { %v321_v12 = vpop.permute.xlu2 %320 }
 0x230   :  { %v333_v17 = vperm.slane %v321_v12, %v1234_v6  ;;  %v481_v12 = vld [vmem:[#allocation3 + $0x18] sm:$0xff] }
 0x238   :  { %v309_v0 = vpop.permute.xlu1 %308 }
 0x239   :  { %v306_v1 = vpop.permute.xlu0 %305  ;;  %v329_v3 = vperm.slane %v309_v0, %v1234_v6  ;;  %v488_v0 = vld [vmem:[#allocation3 + $0x50] sm:$0xff] }
 0x23a   :  { %v328_v4 = vperm.slane %v306_v1, %v1234_v6  ;;  %v498_v1 = vld [vmem:[#allocation3 + $0xa0] sm:$0xff] }
 0x23c   :  { %v336_v5 = vsel %vm236_vm0, %v329_v3, %v328_v4  ;;  %v484_v4 = vld [vmem:[#allocation3 + $0x30] sm:$0xff] }
 0x23d   :  { %v337_v9 = vsel %vm238_vm1, %v330_v8, %v336_v5  ;;  %v485_v5 = vld [vmem:[#allocation3 + $0x38] sm:$0xff] }
 0x23e   :  { %v338_v13 = vsel %vm240_vm2, %v331_v11, %v337_v9  ;;  %v495_v9 = vld [vmem:[#allocation3 + $0x88] sm:$0xff] }
 0x240   :  { %v318_v7 = vpop.permute.xlu1 %317 }
 0x241   :  { %v332_v10 = vperm.slane %v318_v7, %v1234_v6  ;;  %v327_v15 = vpop.permute.xlu0 %326 }
 0x242   :  { %v335_v20 = vperm.slane %v327_v15, %v1234_v6 }
 0x243   :  { %v339_v14 = vsel %vm242_vm3, %v332_v10, %v338_v13  ;;  %v482_v13 = vld [vmem:[#allocation3 + $0x20] sm:$0xff] }
 0x244   :  { %v340_v21 = vsel %vm244_vm4, %v333_v17, %v339_v14  ;;  %v492_v17 = vld [vmem:[#allocation3 + $0x70] sm:$0xff] }
 0x248   :  { %v324_v18 = vpop.permute.xlu1 %323 }
 0x249   :  { %v334_v19 = vperm.slane %v324_v18, %v1234_v6 }
 0x24b   :  { %v341_v22 = vsel %vm246_vm5, %v334_v19, %v340_v21  ;;  %v479_v21 = vld [vmem:[#allocation3 + $0x8] sm:$0xff] }
 0x24c   :  { %v342_v23 = vsel %vm248_vm6, %v335_v20, %v341_v22  ;;  %v478_v20 = vld [vmem:[#allocation3] sm:$0xff]  ;;  %v489_v22 = vld [vmem:[#allocation3 + $0x58] sm:$0xff] }
 0x24d   :  { %v344_v24 = vsel %vm251_vm7, %v342_v23, 0.0 }
 0x24e   :  { %345 = vadd.xlane.f32.xlu2 %v344_v24 }
 0x2c1   :  { %v346_v25 = vpop.xlane.xlu2 %345 }
 0x2c2   :  { %977 = vrcp.f32 %v346_v25 }
 0x2c8   :  { %v978_v26 = vpop.eup %977 }
 0x2c9   :  { %v350_v27 = vperm.slane %v978_v26, 1  ;;  %v349_v28 = vperm.slane %v978_v26, 0  ;;  %v352_v31 = vperm.slane %v978_v26, 3  ;;  %v351_v6 = vperm.slane %v978_v26, 2 }
 0x2ca   :  { %v354_v34 = vperm.slane %v978_v26, 5  ;;  %v353_v35 = vperm.slane %v978_v26, 4  ;;  %v356_v38 = vperm.slane %v978_v26, 7  ;;  %v355_v39 = vperm.slane %v978_v26, 6  ;;  %v103_v26 = vld [vmem:[%s1366_s1 + $0x28] sm:$0xff] }
 0x2cb   :  { %v366_v29 = vmul.f32 %v964_v52, %v350_v27  ;;  %v365_v30 = vmul.f32 %v966_v53, %v349_v28  ;;  %v368_v32 = vmul.f32 %v968_v58, %v352_v31  ;;  %v367_v33 = vmul.f32 %v1252_v50, %v351_v6  ;;  %v496_v52 = vld [vmem:[#allocation3 + $0x90] sm:$0xff]  ;;  %v497_v53 = vld [vmem:[#allocation3 + $0x98] sm:$0xff]  ;;  %v102_v27 = vld [vmem:[%s1366_s1 + $0x20] sm:$0xff] }
 0x2cc   :  { %v370_v36 = vmul.f32 %v974_v61, %v354_v34  ;;  %v369_v37 = vmul.f32 %v970_v59, %v353_v35  ;;  %v372_v40 = vmul.f32 %v972_v60, %v356_v38  ;;  %v371_v41 = vmul.f32 %v976_v62, %v355_v39  ;;  %532 = vmatpush.msra.mxu1 %v496_v52  ;;  %v490_v60 = vld [vmem:[#allocation3 + $0x60] sm:$0xff]  ;;  %v491_v61 = vld [vmem:[#allocation3 + $0x68] sm:$0xff]  ;;  %v501_v62 = vld [vmem:[#allocation3 + $0xb8] sm:$0xff] }
 0x2cd   :  { %380 = vperm.xlu0 %940, %v366_v29   ;;  %375 = vperm.xlu1 %941, %v365_v30   ;;  %v486_v29 = vld [vmem:[#allocation3 + $0x40] sm:$0xff]  ;;  %v483_v34 = vld [vmem:[#allocation3 + $0x28] sm:$0xff] }
 0x2ce   :  { %552 = vmatpush.msra.mxu2 %v497_v53  ;;  %533 = vmatpush.msra.mxu1 %v493_v56 }
 0x2cf   :  { %571 = vmatpush.msra.mxu3 %v501_v62 }
 0x2d0   :  { %553 = vmatpush.msra.mxu2 %v494_v57  ;;  %534 = vmatpush.msra.mxu1 %v490_v60 }
 0x2d1   :  { %572 = vmatpush.msra.mxu3 %v498_v1 }
 0x2d2   :  { %554 = vmatpush.msra.mxu2 %v491_v61  ;;  %594 = vmatpush.msrb.mxu1 %v487_v63 }
 0x2d3   :  { %573 = vmatpush.msra.mxu3 %v495_v9 }
 0x2d4   :  { %614 = vmatpush.msrb.mxu2 %v488_v0  ;;  %595 = vmatpush.msrb.mxu1 %v484_v4 }
 0x2d5   :  { %390 = vperm.xlu0 %940, %v368_v32   ;;  %385 = vperm.xlu1 %941, %v367_v33  }
 0x2d6   :  { %615 = vmatpush.msrb.mxu2 %v485_v5  ;;  %596 = vmatpush.msrb.mxu1 %v481_v12 }
 0x2d7   :  { %574 = vmatpush.msra.mxu3 %v492_v17 }
 0x2d8   :  { %616 = vmatpush.msrb.mxu2 %v482_v13  ;;  %597 = vmatpush.msrb.mxu1 %v478_v20 }
 0x2d9   :  { %634 = vmatpush.msrb.mxu3 %v489_v22 }
 0x2da   :  { %617 = vmatpush.msrb.mxu2 %v479_v21 }
 0x2db   :  { %635 = vmatpush.msrb.mxu3 %v486_v29  ;;  %v699_v29 = vld [vmem:[#allocation5 + $0x170] sm:$0xff] }
 0x2dd   :  { %400 = vperm.xlu0 %940, %v370_v36   ;;  %395 = vperm.xlu1 %941, %v369_v37  }
 0x2de   :  { %636 = vmatpush.msrb.mxu3 %v483_v34  ;;  %v693_v34 = vld [vmem:[#allocation5 + $0x140] sm:$0xff] }
 0x2e5   :  { %410 = vperm.xlu0 %940, %v372_v40   ;;  %405 = vperm.xlu1 %941, %v371_v41   ;;  %v480_v40 = vld [vmem:[#allocation3 + $0x10] sm:$0xff] }
 0x2e6   :  { %637 = vmatpush.msrb.mxu3 %v480_v40  ;;  %v687_v40 = vld [vmem:[#allocation5 + $0x110] sm:$0xff] }
 0x33f   :  { %v381_v44 = vpop.permute.xlu0 %380  ;;  %v376_v45 = vpop.permute.xlu1 %375 }
 0x340   :  { %v414_v46 = vmul.f32 %v381_v44, %v99_v42  ;;  %v413_v47 = vmul.f32 %v376_v45, %v98_v43 }
 0x342   :  { %v429_v50 = vsel %vm421_vm8, %v414_v46, 0.0  ;;  %v422_v51 = vsel %vm421_vm8, %v413_v47, 0.0 }
 0x343   :  { %v430_v58 = vrot.slane %v429_v50, 4  ;;  %v423_v59 = vrot.slane %v422_v51, 4 }
 0x345   :  { %v431_v10 = vadd.f32 %v430_v58, %v429_v50  ;;  %v424_v11 = vadd.f32 %v423_v59, %v422_v51 }
 0x347   :  { %v391_v2 = vpop.permute.xlu0 %390  ;;  %v386_v3 = vpop.permute.xlu1 %385  ;;  %v432_v23 = vrot.slane %v431_v10, 2  ;;  %v425_v24 = vrot.slane %v424_v11, 2 }
 0x348   :  { %v416_v7 = vmul.f32 %v391_v2, %v101_v54  ;;  %v415_v8 = vmul.f32 %v386_v3, %v100_v55 }
 0x349   :  { %v433_v35 = vadd.f32 %v432_v23, %v431_v10  ;;  %v426_v36 = vadd.f32 %v425_v24, %v424_v11 }
 0x34a   :  { %v443_v14 = vsel %vm421_vm8, %v416_v7, 0.0  ;;  %v436_v15 = vsel %vm421_vm8, %v415_v8, 0.0 }
 0x34b   :  { %v444_v18 = vrot.slane %v443_v14, 4  ;;  %v437_v19 = vrot.slane %v436_v15, 4  ;;  %v434_v44 = vrot.slane %v433_v35, 1  ;;  %v427_v45 = vrot.slane %v426_v36, 1 }
 0x34d   :  { %v438_v25 = vadd.f32 %v437_v19, %v436_v15  ;;  %v445_v28 = vadd.f32 %v444_v18, %v443_v14  ;;  %v435_v58 = vadd.f32 %v434_v44, %v433_v35  ;;  %v428_v59 = vadd.f32 %v427_v45, %v426_v36  ;;  %v694_v35 = vld [vmem:[#allocation5 + $0x148] sm:$0xff]  ;;  %v689_v36 = vld [vmem:[#allocation5 + $0x120] sm:$0xff]  ;;  %v688_v44 = vld [vmem:[#allocation5 + $0x118] sm:$0xff] }
 0x34e   :  { %v680_v45 = vld [vmem:[#allocation5 + $0xd8] sm:$0xff] }
 0x34f   :  { %v439_v30 = vrot.slane %v438_v25, 2  ;;  %v401_v31 = vpop.permute.xlu0 %400  ;;  %v396_v6 = vpop.permute.xlu1 %395  ;;  %v446_v37 = vrot.slane %v445_v28, 2  ;;  %v510_v8 = vsel %vm236_vm0, %v435_v58, %v428_v59  ;;  %v669_v58 = vld [vmem:[#allocation5 + $0x80] sm:$0xff] }
 0x350   :  { %v418_v32 = vmul.f32 %v401_v31, %v103_v26  ;;  %v417_v33 = vmul.f32 %v396_v6, %v102_v27  ;;  %v698_v27 = vld [vmem:[#allocation5 + $0x168] sm:$0xff]  ;;  %v695_v31 = vld [vmem:[#allocation5 + $0x150] sm:$0xff]  ;;  %v696_v6 = vld [vmem:[#allocation5 + $0x158] sm:$0xff] }
 0x351   :  { %v440_v41 = vadd.f32 %v439_v30, %v438_v25  ;;  %v447_v50 = vadd.f32 %v446_v37, %v445_v28  ;;  %v700_v30 = vld [vmem:[#allocation5 + $0x178] sm:$0xff]  ;;  %v690_v37 = vld [vmem:[#allocation5 + $0x128] sm:$0xff]  ;;  %v673_v59 = vld [vmem:[#allocation5 + $0xa0] sm:$0xff] }
 0x352   :  { %v457_v38 = vsel %vm421_vm8, %v418_v32, 0.0  ;;  %v450_v39 = vsel %vm421_vm8, %v417_v33, 0.0  ;;  %v697_v32 = vld [vmem:[#allocation5 + $0x160] sm:$0xff]  ;;  %v692_v33 = vld [vmem:[#allocation5 + $0x138] sm:$0xff] }
 0x353   :  { %v458_v42 = vrot.slane %v457_v38, 4  ;;  %v451_v43 = vrot.slane %v450_v39, 4  ;;  %v441_v51 = vrot.slane %v440_v41, 1  ;;  %v448_v61 = vrot.slane %v447_v50, 1 }
 0x355   :  { %v459_v46 = vadd.f32 %v458_v42, %v457_v38  ;;  %v452_v47 = vadd.f32 %v451_v43, %v450_v39  ;;  %v442_v1 = vadd.f32 %v441_v51, %v440_v41  ;;  %v449_v9 = vadd.f32 %v448_v61, %v447_v50  ;;  %v1322_v38 = vld [vmem:[%s1365_s0] sm:$0xff]  ;;  %v686_v39 = vld [vmem:[#allocation5 + $0x108] sm:$0xff]  ;;  %v691_v41 = vld [vmem:[#allocation5 + $0x130] sm:$0xff] }
 0x356   :  { %v683_v42 = vld [vmem:[#allocation5 + $0xf0] sm:$0xff]  ;;  %v684_v43 = vld [vmem:[#allocation5 + $0xf8] sm:$0xff]  ;;  %v682_v50 = vld [vmem:[#allocation5 + $0xe8] sm:$0xff] }
 0x357   :  { %v460_v52 = vrot.slane %v459_v46, 2  ;;  %v453_v53 = vrot.slane %v452_v47, 2  ;;  %v411_v54 = vpop.permute.xlu0 %410  ;;  %v406_v55 = vpop.permute.xlu1 %405  ;;  %v511_v11 = vsel %vm238_vm1, %v442_v1, %v510_v8  ;;  %v674_v51 = vld [vmem:[#allocation5 + $0xa8] sm:$0xff]  ;;  %v667_v1 = vld [vmem:[#allocation5 + $0x70] sm:$0xff]  ;;  %v661_v8 = vld [vmem:[#allocation5 + $0x40] sm:$0xff] }
 0x358   :  { %v420_v56 = vmul.f32 %v411_v54, %v105_v48  ;;  %v419_v57 = vmul.f32 %v406_v55, %v104_v49  ;;  %v512_v19 = vsel %vm240_vm2, %v449_v9, %v511_v11  ;;  %v677_v48 = vld [vmem:[#allocation5 + $0xc0] sm:$0xff]  ;;  %v678_v49 = vld [vmem:[#allocation5 + $0xc8] sm:$0xff]  ;;  %v671_v54 = vld [vmem:[#allocation5 + $0x90] sm:$0xff] }
 0x359   :  { %v454_v60 = vadd.f32 %v453_v53, %v452_v47  ;;  %v461_v62 = vadd.f32 %v460_v52, %v459_v46  ;;  %v681_v46 = vld [vmem:[#allocation5 + $0xe0] sm:$0xff]  ;;  %v675_v52 = vld [vmem:[#allocation5 + $0xb0] sm:$0xff]  ;;  %v672_v55 = vld [vmem:[#allocation5 + $0x98] sm:$0xff] }
 0x35a   :  { %v471_v63 = vsel %vm421_vm8, %v420_v56, 0.0  ;;  %v464_v0 = vsel %vm421_vm8, %v419_v57, 0.0  ;;  %v685_v47 = vld [vmem:[#allocation5 + $0x100] sm:$0xff]  ;;  %v679_v53 = vld [vmem:[#allocation5 + $0xd0] sm:$0xff]  ;;  %v676_v56 = vld [vmem:[#allocation5 + $0xb8] sm:$0xff] }
 0x35b   :  { %v455_v2 = vrot.slane %v454_v60, 1  ;;  %v472_v3 = vrot.slane %v471_v63, 4  ;;  %v465_v4 = vrot.slane %v464_v0, 4  ;;  %v462_v10 = vrot.slane %v461_v62, 1  ;;  %v668_v57 = vld [vmem:[#allocation5 + $0x78] sm:$0xff]  ;;  %v666_v61 = vld [vmem:[#allocation5 + $0x68] sm:$0xff] }
 0x35c   :  { %v653_v9 = vld [vmem:[#allocation5] sm:$0xff]  ;;  %v823_v11 = vld [vmem:[#allocation7 + $0x38] sm:$0xff] }
 0x35d   :  { %v473_v5 = vadd.f32 %v472_v3, %v471_v63  ;;  %v466_v7 = vadd.f32 %v465_v4, %v464_v0  ;;  %v456_v12 = vadd.f32 %v455_v2, %v454_v60  ;;  %v463_v18 = vadd.f32 %v462_v10, %v461_v62  ;;  %v665_v60 = vld [vmem:[#allocation5 + $0x60] sm:$0xff]  ;;  %v670_v62 = vld [vmem:[#allocation5 + $0x88] sm:$0xff]  ;;  %v663_v0 = vld [vmem:[#allocation5 + $0x50] sm:$0xff] }
 0x35e   :  { %v662_v63 = vld [vmem:[#allocation5 + $0x48] sm:$0xff]  ;;  %v659_v2 = vld [vmem:[#allocation5 + $0x30] sm:$0xff]  ;;  %v660_v3 = vld [vmem:[#allocation5 + $0x38] sm:$0xff] }
 0x35f   :  { %v474_v13 = vrot.slane %v473_v5, 2  ;;  %v467_v14 = vrot.slane %v466_v7, 2  ;;  %v513_v22 = vsel %vm242_vm3, %v456_v12, %v512_v19  ;;  %v664_v4 = vld [vmem:[#allocation5 + $0x58] sm:$0xff]  ;;  %v654_v10 = vld [vmem:[#allocation5 + $0x8] sm:$0xff] }
 0x360   :  { %v514_v25 = vsel %vm244_vm4, %v463_v18, %v513_v22  ;;  %v819_v12 = vld [vmem:[#allocation7 + $0x18] sm:$0xff]  ;;  %v821_v18 = vld [vmem:[#allocation7 + $0x28] sm:$0xff] }
 0x361   :  { %v475_v15 = vadd.f32 %v474_v13, %v473_v5  ;;  %v468_v17 = vadd.f32 %v467_v14, %v466_v7  ;;  %v656_v5 = vld [vmem:[#allocation5 + $0x18] sm:$0xff]  ;;  %v657_v7 = vld [vmem:[#allocation5 + $0x20] sm:$0xff]  ;;  %v658_v13 = vld [vmem:[#allocation5 + $0x28] sm:$0xff] }
 0x362   :  { %v822_v14 = vld [vmem:[#allocation7 + $0x30] sm:$0xff]  ;;  %v817_v19 = vld [vmem:[#allocation7 + $0x8] sm:$0xff] }
 0x363   :  { %v476_v20 = vrot.slane %v475_v15, 1  ;;  %v469_v21 = vrot.slane %v468_v17, 1 }
 0x365   :  { %v477_v23 = vadd.f32 %v476_v20, %v475_v15  ;;  %v470_v24 = vadd.f32 %v469_v21, %v468_v17  ;;  %v818_v15 = vld [vmem:[#allocation7 + $0x10] sm:$0xff]  ;;  %v820_v20 = vld [vmem:[#allocation7 + $0x20] sm:$0xff] }
 0x366   :  { %v655_v17 = vld [vmem:[#allocation5 + $0x10] sm:$0xff]  ;;  %v816_v21 = vld [vmem:[#allocation7] sm:$0xff] }
 0x367   :  { %v515_v26 = vsel %vm246_vm5, %v470_v24, %v514_v25  ;;  %v879_v24 = vld [vmem:[#allocation7 + $0xb8] sm:$0xff]  ;;  %v878_v25 = vld [vmem:[#allocation7 + $0xb0] sm:$0xff] }
 0x368   :  { %v1311_v28 = vsel %vm248_vm6, %v477_v23, %v515_v26  ;;  %880 = vmatpush.msrb.mxu0 %v879_v24 }
 0x369   :  { %922 = vmatmul.msk.f32.vlgmr.msra.gmra.mxu1 %vm421_vm8, %v1311_v28  ;;  %923 = vmatmul.msk.f32.vlgmr.msra.gmra.mxu2 %vm421_vm8, %v1311_v28 }
 0x36a   :  { %924 = vmatmul.msk.f32.vlgmr.msra.gmra.mxu3 %vm421_vm8, %v1311_v28  ;;  %709 = vmatpush.msra.mxu1 %v698_v27  ;;  %v877_v27 = vld [vmem:[#allocation7 + $0xa8] sm:$0xff] }
 0x36b   :  { %729 = vmatpush.msra.mxu2 %v699_v29  ;;  %749 = vmatpush.msra.mxu3 %v700_v30  ;;  %v876_v29 = vld [vmem:[#allocation7 + $0xa0] sm:$0xff]  ;;  %v875_v30 = vld [vmem:[#allocation7 + $0x98] sm:$0xff] }
 0x36c   :  { %710 = vmatpush.msra.mxu1 %v695_v31  ;;  %881 = vmatpush.msrb.mxu0 %v878_v25 }
 0x36d   :  { %730 = vmatpush.msra.mxu2 %v696_v6  ;;  %750 = vmatpush.msra.mxu3 %v697_v32 }
 0x36e   :  { %711 = vmatpush.msra.mxu1 %v692_v33  ;;  %882 = vmatpush.msrb.mxu0 %v877_v27  ;;  %v874_v33 = vld [vmem:[#allocation7 + $0x90] sm:$0xff] }
 0x36f   :  { %731 = vmatpush.msra.mxu2 %v693_v34  ;;  %751 = vmatpush.msra.mxu3 %v694_v35  ;;  %v873_v35 = vld [vmem:[#allocation7 + $0x88] sm:$0xff] }
 0x370   :  { %712 = vmatpush.msra.mxu1 %v689_v36  ;;  %883 = vmatpush.msrb.mxu0 %v876_v29 }
 0x371   :  { %732 = vmatpush.msra.mxu2 %v690_v37  ;;  %925 = vmatmul.msk.f32.vlgmr.msrb.gmra.mxu1 %vm421_vm8, %v1322_v38 }
 0x372   :  { %926 = vmatmul.msk.f32.vlgmr.msrb.gmra.mxu2 %vm421_vm8, %v1322_v38  ;;  %927 = vmatmul.msk.f32.vlgmr.msrb.gmra.mxu3 %vm421_vm8, %v1322_v38 }
 0x373   :  { %713 = vmatpush.msra.mxu1 %v686_v39  ;;  %733 = vmatpush.msra.mxu2 %v687_v40  ;;  %v872_v39 = vld [vmem:[#allocation7 + $0x80] sm:$0xff] }
 0x374   :  { %752 = vmatpush.msra.mxu3 %v691_v41  ;;  %884 = vmatpush.msrb.mxu0 %v875_v30 }
 0x375   :  { %714 = vmatpush.msra.mxu1 %v683_v42  ;;  %734 = vmatpush.msra.mxu2 %v684_v43 }
 0x376   :  { %753 = vmatpush.msra.mxu3 %v688_v44  ;;  %885 = vmatpush.msrb.mxu0 %v874_v33  ;;  %v871_v44 = vld [vmem:[#allocation7 + $0x78] sm:$0xff] }
 0x377   :  { %715 = vmatpush.msra.mxu1 %v680_v45  ;;  %735 = vmatpush.msra.mxu2 %v681_v46  ;;  %v870_v46 = vld [vmem:[#allocation7 + $0x70] sm:$0xff] }
 0x378   :  { %754 = vmatpush.msra.mxu3 %v685_v47  ;;  %886 = vmatpush.msrb.mxu0 %v873_v35 }
 0x379   :  { %716 = vmatpush.msra.mxu1 %v677_v48  ;;  %736 = vmatpush.msra.mxu2 %v678_v49  ;;  %v869_v48 = vld [vmem:[#allocation7 + $0x68] sm:$0xff] }
 0x37a   :  { %755 = vmatpush.msra.mxu3 %v682_v50  ;;  %887 = vmatpush.msrb.mxu0 %v872_v39 }
 0x37b   :  { %717 = vmatpush.msra.mxu1 %v674_v51  ;;  %737 = vmatpush.msra.mxu2 %v675_v52  ;;  %v868_v52 = vld [vmem:[#allocation7 + $0x60] sm:$0xff] }
 0x37c   :  { %756 = vmatpush.msra.mxu3 %v679_v53  ;;  %888 = vmatpush.msrb.mxu0 %v871_v44 }
 0x37d   :  { %718 = vmatpush.msra.mxu1 %v671_v54  ;;  %738 = vmatpush.msra.mxu2 %v672_v55  ;;  %v867_v54 = vld [vmem:[#allocation7 + $0x58] sm:$0xff] }
 0x37e   :  { %757 = vmatpush.msra.mxu3 %v676_v56  ;;  %889 = vmatpush.msrb.mxu0 %v870_v46  ;;  %v866_v56 = vld [vmem:[#allocation7 + $0x50] sm:$0xff] }
 0x37f   :  { %719 = vmatpush.msra.mxu1 %v668_v57  ;;  %739 = vmatpush.msra.mxu2 %v669_v58 }
 0x380   :  { %758 = vmatpush.msra.mxu3 %v673_v59  ;;  %890 = vmatpush.msrb.mxu0 %v869_v48  ;;  %v865_v59 = vld [vmem:[#allocation7 + $0x48] sm:$0xff] }
 0x381   :  { %720 = vmatpush.msra.mxu1 %v665_v60  ;;  %740 = vmatpush.msra.mxu2 %v666_v61  ;;  %v864_v60 = vld [vmem:[#allocation7 + $0x40] sm:$0xff] }
 0x382   :  { %759 = vmatpush.msra.mxu3 %v670_v62  ;;  %891 = vmatpush.msrb.mxu0 %v868_v52 }
 0x383   :  { %721 = vmatpush.msra.mxu1 %v662_v63  ;;  %741 = vmatpush.msra.mxu2 %v663_v0 }
 0x384   :  { %760 = vmatpush.msra.mxu3 %v667_v1  ;;  %892 = vmatpush.msrb.mxu0 %v867_v54 }
 0x385   :  { %722 = vmatpush.msra.mxu1 %v659_v2  ;;  %742 = vmatpush.msra.mxu2 %v660_v3 }
 0x386   :  { %761 = vmatpush.msra.mxu3 %v664_v4  ;;  %893 = vmatpush.msrb.mxu0 %v866_v56 }
 0x387   :  { %723 = vmatpush.msra.mxu1 %v656_v5  ;;  %743 = vmatpush.msra.mxu2 %v657_v7 }
 0x388   :  { %762 = vmatpush.msra.mxu3 %v661_v8  ;;  %894 = vmatpush.msrb.mxu0 %v865_v59 }
 0x389   :  { %724 = vmatpush.msra.mxu1 %v653_v9  ;;  %744 = vmatpush.msra.mxu2 %v654_v10 }
 0x38a   :  { %725 = vmatmul.f32.vlgmr.msra.gmra.mxu1 %v1204_v16  ;;  %745 = vmatmul.f32.vlgmr.msra.gmra.mxu2 %v1204_v16 }
 0x38b   :  { %836 = vmatpush.msrb.mxu1 %v823_v11  ;;  %856 = vmatpush.msrb.mxu2 %v819_v12 }
 0x38c   :  { %763 = vmatpush.msra.mxu3 %v658_v13  ;;  %895 = vmatpush.msrb.mxu0 %v864_v60 }
 0x38d   :  { %837 = vmatpush.msrb.mxu1 %v822_v14  ;;  %857 = vmatpush.msrb.mxu2 %v818_v15 }
 0x38e   :  { %764 = vmatpush.msra.mxu3 %v655_v17 }
 0x38f   :  { %838 = vmatpush.msrb.mxu1 %v821_v18  ;;  %858 = vmatpush.msrb.mxu2 %v817_v19 }
 0x390   :  { %765 = vmatmul.f32.vlgmr.msra.gmra.mxu3 %v1204_v16  ;;  %v1340_v16 = vld [vmem:[%s1373_s8] sm:$0x7] }
 0x391   :  { %839 = vmatpush.msrb.mxu1 %v820_v20  ;;  %859 = vmatpush.msrb.mxu2 %v816_v21  ;;  %v644_v6 = vperm.slane %v1340_v16, 0  ;;  %v645_v41 = vperm.slane %v1340_v16, 1  ;;  %v646_v11 = vperm.slane %v1340_v16, 2 }
 0x392   :  { %930 = vmatmul.msk.f32.vlgmr.msrb.gmra.mxu1 %vm421_vm8, %v1311_v28  ;;  %931 = vmatmul.msk.f32.vlgmr.msrb.gmra.mxu2 %vm421_vm8, %v1322_v38  ;;  %v1345_v28 = vld [vmem:[%s1374_s9] sm:$0x7] }
 0x393   :  { %v703_v32 = vperm.slane %v1345_v28, 0  ;;  %v704_v43 = vperm.slane %v1345_v28, 1  ;;  %v705_v2 = vperm.slane %v1345_v28, 2 }
 0x3e6   :  { %v536_v22 = vpop.f32.mrf.mxu1 }
 0x3ec   :  { %v556_v23 = vpop.f32.mrf.mxu2 }
 0x3ed   :  { %v576_v51 = vpop.f32.mrf.mxu3 }
 0x3ee   :  { %v599_v26 = vpop.f32.mrf.mxu1 }
 0x3ef   :  { %v600_v31 = vadd.f32 %v599_v26, %v536_v22 }
 0x3f1   :  { %v650_v37 = vadd.f32 %v644_v6, %v600_v31  ;;  %v989_v6 = vld [vmem:[%s1368_s3] sm:$0xff] }
 0x3f5   :  { %v619_v34 = vpop.f32.mrf.mxu2  ;;  %v639_v61 = vpop.f32.mrf.mxu3 }
 0x3f6   :  { %v620_v40 = vadd.f32 %v619_v34, %v556_v23  ;;  %v640_v10 = vadd.f32 %v639_v61, %v576_v51 }
 0x3f8   :  { %v651_v49 = vadd.f32 %v645_v41, %v620_v40  ;;  %v652_v19 = vadd.f32 %v646_v11, %v640_v10 }
 0x407   :  { %v726_v36 = vpop.f32.mrf.mxu1 }
 0x408   :  { %v727_v38 = vadd.f32 %v726_v36, %v703_v32 }
 0x40a   :  { %v769_v42 = vadd.f32 %v727_v38, %v650_v37  ;;  %v944_v37 = vld [vmem:[%s1376_s11] ss:$0 sm:$0xff] }
 0x40c   :  { %v928_v45 = vmul.f32 -1.442695, %v769_v42 }
 0x40d   :  { %v746_v47 = vpop.f32.mrf.mxu2 }
 0x40e   :  { %979 = vpow2.f32 %v928_v45  ;;  %v747_v50 = vadd.f32 %v746_v47, %v704_v43 }
 0x40f   :  { %v841_v35 = vpop.f32.mrf.mxu1 }
 0x410   :  { %v789_v53 = vadd.f32 %v747_v50, %v651_v49 }
 0x412   :  { %v929_v55 = vmul.f32 -1.442695, %v789_v53 }
 0x413   :  { %v766_v4 = vpop.f32.mrf.mxu3 }
 0x414   :  { %v980_v57 = vpop.eup %979  ;;  %981 = vpow2.f32 %v929_v55  ;;  %v767_v13 = vadd.f32 %v766_v4, %v705_v2 }
 0x415   :  { %v773_v58 = vadd.f32 1.0, %v980_v57  ;;  %v861_v34 = vpop.f32.mrf.mxu2 }
 0x416   :  { %v862_v36 = vadd.f32 %v861_v34, %v841_v35 }
 0x417   :  { %983 = vrcp.f32 %v773_v58  ;;  %v785_v5 = vand.u32 2147483648, %v773_v58  ;;  %v783_v8 = vand.u32 2147483647, %v773_v58  ;;  %vm779_vm10 = vweird.f32 %v773_v58 }
 0x419   :  { %v786_v15 = vor.u32 1.1754944e-38, %v785_v5  ;;  %vm784_vm12 = vcmp.eq.f32.partialorder %v783_v8, 8.507059e+37 }
 0x41a   :  { %v982_v62 = vpop.eup %981 }
 0x41b   :  { %v793_v63 = vadd.f32 1.0, %v982_v62 }
 0x41d   :  { %v984_v0 = vpop.eup %983  ;;  %985 = vrcp.f32 %v793_v63  ;;  %v805_v23 = vand.u32 2147483648, %v793_v63  ;;  %v803_v24 = vand.u32 2147483647, %v793_v63  ;;  %vm799_vm14 = vweird.f32 %v793_v63 }
 0x41e   :  { %v775_v1 = vmul.f32 %v984_v0, %v773_v58  ;;  %vm780_vm9 = vweird.f32 %v984_v0 }
 0x41f   :  { %vm781_vm11 = vmor %vm779_vm10, %vm780_vm9  ;;  %v806_v16 = vor.u32 1.1754944e-38, %v805_v23  ;;  %vm804_vm0 = vcmp.eq.f32.partialorder %v803_v24, 8.507059e+37 }
 0x420   :  { %v776_v3 = vsub.f32 1.0, %v775_v1 }
 0x422   :  { %v777_v7 = vmul.f32 %v984_v0, %v776_v3 }
 0x423   :  { %v986_v9 = vpop.eup %985 }
 0x424   :  { %v795_v12 = vmul.f32 %v986_v9, %v793_v63  ;;  %v778_v14 = vadd.f32 %v984_v0, %v777_v7  ;;  %vm800_vm13 = vweird.f32 %v986_v9 }
 0x425   :  { %vm801_vm15 = vmor %vm799_vm14, %vm800_vm13 }
 0x426   :  { %v782_v17 = vsel %vm781_vm11, %v984_v0, %v778_v14  ;;  %v796_v18 = vsub.f32 1.0, %v795_v12 }
 0x427   :  { %v787_v20 = vsel %vm784_vm12, %v786_v15, %v782_v17 }
 0x428   :  { %v809_v21 = vmul.f32 %v787_v20, %v767_v13  ;;  %v797_v22 = vmul.f32 %v986_v9, %v796_v18 }
 0x42a   :  { %v810_v25 = vadd.f32 %v809_v21, %v652_v19  ;;  %v798_v26 = vadd.f32 %v986_v9, %v797_v22 }
 0x42c   :  { %987 = vtanh.f32 %v810_v25  ;;  %v802_v27 = vsel %vm801_vm15, %v986_v9, %v798_v26 }
 0x42d   :  { %v807_v28 = vsel %vm804_vm0, %v806_v16, %v802_v27 }
 0x42e   :  { %v812_v29 = vsub.f32 1.0, %v807_v28  ;;  %v814_v32 = vmul.f32 %v989_v6, %v807_v28 }
 0x432   :  { %v988_v30 = vpop.eup %987 }
 0x433   :  { %v813_v31 = vmul.f32 %v988_v30, %v812_v29 }
 0x435   :  { %v815_v33 = vadd.f32 %v814_v32, %v813_v31 }
 0x437   :  { %896 = vmatmul.f32.vlgmr.msrb.gmra.mxu0 %v815_v33  ;;  %911 = vst [vmem:[%s1378_s13] sm:$0xff] %v815_v33 }
 0x4b4   :  { %v897_v38 = vpop.f32.mrf.mxu0 }
 0x4b5   :  { %v900_v39 = vadd.f32 %v897_v38, %v862_v36 }
 0x4b7   :  { %v905_v40 = vadd.f32 %v944_v37, %v900_v39 }
 0x4b9   :  { %906 = vst [vmem:[%s1377_s12] sm:$0xff] %v905_v40 }
 0x4ba   :  { %920 = vsyncpa [#allocation4], 1 }
 0x4bb   :  { %921 = vsyncpa [#allocation6], 1 }

</bundles_post_ra>
